<compile_context>
chip_gen: v7x
topology: tpu7x:2x2x1
jax: 0.10.0
libtpu: 0.0.40
codegen_flags: <defaults>
</compile_context>

<pallas_src>
import jax
import jax.numpy as jnp
import numpy as np
from jax.experimental import pallas as pl
from jax.experimental.pallas import tpu as pltpu


def _round_up(x, m):
    return (x + m - 1) // m * m


def _vmem_limit_bytes():
    """Generation-aware scoped-VMEM limit: half of physical VMEM, capped at 64 MiB.

    v5e/v6e (128 MiB physical) -> 64 MiB; v7x (64 MiB physical) or unknown -> 32 MiB.
    """
    cap = None
    try:
        info = pltpu.get_tpu_info()
        for name in ("vmem_capacity_bytes", "vmem_bytes", "vmem_size_bytes"):
            if hasattr(info, name):
                cap = int(getattr(info, name))
                break
    except Exception:
        cap = None
    if cap is None:
        cap = 64 * 1024 * 1024          # conservative: v7x per-TensorCore physical VMEM
    return max(32 * 1024 * 1024, min(cap // 2, 64 * 1024 * 1024))


def _capsule_att_kernel(x_ref, len_ref, av_ref, w_ref, b_ref, prob_ref, rsp_ref):
    """One batch tile of the Capsule_Att forward pass.

    x_ref    : (TB, T, Dp)   hidden states, native dtype (bf16/f32) - never copied to f32
    len_ref  : (TB, 1, 1)    int32 valid lengths
    av_ref   : (1, 1, Dp)    attention vector, x dtype, zero-padded
    w_ref    : (1, 1, Dp)    linear_prob weight (f32, zero-padded)
    b_ref    : (1, 1, 128)   linear_prob bias broadcast over 128 lanes (f32)
    prob_ref : (TB, 1, 128)  sigmoid prob broadcast over 128 lanes (f32)
    rsp_ref  : (TB, 1, Dp)   prob * r_s (f32)
    """
    tb, t, dp = x_ref.shape

    x = x_ref[...]                                                        # native dtype
    av = jnp.broadcast_to(av_ref[...], (tb, 1, dp))                       # x dtype

    # logits[b, t] = <x[b, t, :], attention_vector>  -- MXU, bf16 in / f32 accumulate.
    scores = jnp.einsum("bqd,btd->bqt", av, x,
                        preferred_element_type=jnp.float32)               # (TB,1,T) f32

    # Length mask + per-row masked max (shift-invariant per row => identical to the
    # module's global max, but keeps batch tiles independent).
    idx = jax.lax.broadcasted_iota(jnp.int32, (tb, 1, t), 2)              # (TB,1,T)
    valid = idx < len_ref[...]                                            # (TB,1,T)
    neg = jnp.float32(-1e30)
    scores_m = jnp.where(valid, scores, neg)
    row_max = jnp.max(scores_m, axis=-1, keepdims=True)                   # (TB,1,1)
    row_max = jnp.where(row_max > neg * 0.5, row_max, 0.0)                # all-masked guard
    p = jnp.exp(scores_m - row_max)                                       # masked -> 0
    denom = jnp.sum(p, axis=-1, keepdims=True)                            # (TB,1,1)
    # NOTE: a row with length 0 gives denom == 0 -> NaN, same as the reference.
    attn = p * pl.reciprocal(denom, approx=True)                          # (TB,1,T) f32

    # r_s[b, :] = sum_t attn[b, t] * x[b, t, :]  -- MXU; attn cast to x dtype
    # (standard flash-attention practice), f32 accumulation.
    r_s = jnp.einsum("bqt,btd->bqd", attn.astype(x.dtype), x,
                     preferred_element_type=jnp.float32)                  # (TB,1,Dp) f32

    # linear_prob + sigmoid (final_dropout is identity in eval mode).
    w = w_ref[...]                                                        # (1,1,Dp) f32
    z = jnp.sum(r_s * w, axis=-1, keepdims=True) + b_ref[...]             # (TB,1,128)
    prob = jax.nn.sigmoid(z)                                              # lanes all equal

    prob_ref[...] = prob.astype(prob_ref.dtype)
    rsp_ref[...] = (prob[:, :, :1] * r_s).astype(rsp_ref.dtype)


def capsule_att(matrix_hidden_pad, len_hidden_pad, attention_vector, lin_w,
                lin_b, *, block_b=None):
    """Capsule_Att forward (eval). Returns (prob (B, 1), r_s_prob (B, D))."""
    x = matrix_hidden_pad                       # native dtype; NO f32 copy anywhere
    B, T, D = x.shape
    itemsize = jnp.dtype(x.dtype).itemsize

    # Pad T (sublane axis) / D (lane axis) only when actually unaligned.  The batch is
    # never padded: grid = pl.cdiv(B, tb) and Pallas handles the partial last block.
    tp = _round_up(T, 8)
    dp = _round_up(D, 128)
    if (tp, dp) != (T, D):
        x = jnp.pad(x, ((0, 0), (0, tp - T), (0, dp - D)))

    vmem_limit = _vmem_limit_bytes()
    if block_b is None:
        # Per-batch-row VMEM bytes (sublane/lane padded): x tile + lens + prob + rsp blocks.
        per_row = tp * dp * itemsize + 4096 + 4096 + 8 * dp * 4
        budget = int(vmem_limit * 0.85) // 2    # double-buffered pipeline, ~15% headroom
        block_b = max(1, budget // per_row)
    tb = int(max(1, min(int(block_b), B)))

    lens = jnp.asarray(len_hidden_pad, dtype=jnp.int32).reshape(B, 1, 1)
    av = jnp.pad(jnp.asarray(attention_vector, jnp.float32).reshape(1, 1, D),
                 ((0, 0), (0, 0), (0, dp - D))).astype(x.dtype)
    w = jnp.pad(jnp.asarray(lin_w, jnp.float32).reshape(1, 1, D),
                ((0, 0), (0, 0), (0, dp - D)))
    b = jnp.broadcast_to(jnp.asarray(lin_b, jnp.float32).reshape(1, 1, 1), (1, 1, 128))

    grid = (pl.cdiv(B, tb),)
    cost = pl.CostEstimate(
        flops=int(4 * B * tp * dp + 8 * B * tp + 4 * B * dp),
        transcendentals=int(B * tp + 2 * B),
        bytes_accessed=int(B * tp * dp * itemsize + B * (dp + 128) * 4
                           + (2 * dp + 128) * 4),
    )

    prob_full, rsp_full = pl.pallas_call(
        _capsule_att_kernel,
        grid=grid,
        in_specs=[
            pl.BlockSpec((tb, tp, dp), lambda i: (i, 0, 0)),   # x (native dtype)
            pl.BlockSpec((tb, 1, 1), lambda i: (i, 0, 0)),     # lengths
            pl.BlockSpec((1, 1, dp), lambda i: (0, 0, 0)),     # attention_vector
            pl.BlockSpec((1, 1, dp), lambda i: (0, 0, 0)),     # linear_prob weight
            pl.BlockSpec((1, 1, 128), lambda i: (0, 0, 0)),    # linear_prob bias
        ],
        out_specs=(
            pl.BlockSpec((tb, 1, 128), lambda i: (i, 0, 0)),   # prob (lane-dense)
            pl.BlockSpec((tb, 1, dp), lambda i: (i, 0, 0)),    # r_s_prob (lane-dense)
        ),
        out_shape=(
            jax.ShapeDtypeStruct((B, 1, 128), jnp.float32),
            jax.ShapeDtypeStruct((B, 1, dp), jnp.float32),
        ),
        compiler_params=pltpu.CompilerParams(
            dimension_semantics=("parallel",),
            vmem_limit_bytes=vmem_limit,
        ),
        cost_estimate=cost,
    )(x, lens, av, w, b)

    prob = prob_full[:, 0, :1]        # (B, 1)
    r_s_prob = rsp_full[:, 0, :D]     # (B, D)
    return prob, r_s_prob


def capsule_att_reference(matrix_hidden_pad, len_hidden_pad, attention_vector,
                          lin_w, lin_b):
    """Pure-JAX reference mirroring the PyTorch module (eval mode)."""
    with jax.default_matmul_precision("highest"):
        x = matrix_hidden_pad.astype(jnp.float32)
        B, T, D = x.shape
        logits = jnp.einsum("btd,d->bt", x, attention_vector.astype(jnp.float32))
        unnorm = jnp.exp(logits - jnp.max(logits))        # DeepMoji global max
        mask = (jnp.arange(T)[None, :]
                < jnp.asarray(len_hidden_pad, jnp.int32)[:, None]).astype(jnp.float32)
        masked = unnorm * mask
        attn = masked / jnp.sum(masked, axis=1, keepdims=True)
        r_s = jnp.sum(x * attn[:, :, None], axis=1)
        prob = jax.nn.sigmoid(
            jnp.einsum("bd,d->b", r_s, lin_w.reshape(D).astype(jnp.float32))[:, None]
            + jnp.asarray(lin_b, jnp.float32).reshape(1, 1))
        return prob, prob * r_s


def _run_case(key, B, T, D, x_dtype, block_b=None):
    k_x, k_vi, k_av, k_w, k_b, k_len = jax.random.split(key, 6)
    x = jax.random.normal(k_x, (B, T, D), dtype=jnp.float32).astype(x_dtype)
    vect_instance = jax.random.normal(k_vi, (B, D), dtype=jnp.float32)
    _ = vect_instance   # unused by the forward pass, exactly as in the PyTorch module
    lengths = jax.random.randint(k_len, (B,), 1, T + 1, dtype=jnp.int32)

    # Deterministic synthetic parameters (not a checkpoint):
    # Attention.attention_vector ~ N(0, 0.05) (DeepMoji init);
    # nn.Linear(dim_vector, 1): U(-1/sqrt(D), 1/sqrt(D)).
    attention_vector = 0.05 * jax.random.normal(k_av, (D,), dtype=jnp.float32)
    bound = 1.0 / np.sqrt(D)
    lin_w = jax.random.uniform(k_w, (1, D), minval=-bound, maxval=bound,
                               dtype=jnp.float32)
    lin_b = jax.random.uniform(k_b, (1,), minval=-bound, maxval=bound,
                               dtype=jnp.float32)

    prob, r_s_prob = capsule_att(x, lengths, attention_vector, lin_w, lin_b,
                                 block_b=block_b)
    jax.block_until_ready((prob, r_s_prob))

    prob_ref, rsp_ref = capsule_att_reference(x, lengths, attention_vector,
                                              lin_w, lin_b)
    # Tolerance covers the bf16 MXU path and the approximate EUP reciprocal.
    np.testing.assert_allclose(np.asarray(prob), np.asarray(prob_ref),
                               atol=1e-2, rtol=1e-2)
    np.testing.assert_allclose(np.asarray(r_s_prob), np.asarray(rsp_ref),
                               atol=1e-2, rtol=1e-2)


if __name__ == "__main__":
    key = jax.random.PRNGKey(0)
    k1, k2, k3 = jax.random.split(key, 3)

    # Small shapes consistent with the module: (batch, seq, dim_vector).
    _run_case(k1, B=2, T=8, D=32, x_dtype=jnp.float32)

    # bf16 at the HBM boundary, multi-block pipelined batch grid (block_b=8 -> 4 steps).
    _run_case(k2, B=32, T=128, D=256, x_dtype=jnp.bfloat16, block_b=8)

    # Batch not divisible by the block: exercises the pl.cdiv grid / partial last
    # block path that replaces the old wrapper-side batch pad copy.
    _run_case(k3, B=30, T=128, D=256, x_dtype=jnp.bfloat16, block_b=8)

    print("KERNEL_OK")
</pallas_src>

<mosaic_0001>
module attributes {stable_mosaic.version = 11 : i64} {
  func.func @_capsule_att_kernel(%arg0: i32, %arg1: memref<2x8x128xf32, #tpu.memory_space<vmem>>, %arg2: memref<2x1x1xi32, #tpu.memory_space<vmem>>, %arg3: memref<1x1x128xf32, #tpu.memory_space<vmem>>, %arg4: memref<1x1x128xf32, #tpu.memory_space<vmem>>, %arg5: memref<1x1x128xf32, #tpu.memory_space<vmem>>, %arg6: memref<2x1x128xf32, #tpu.memory_space<vmem>>, %arg7: memref<2x1x128xf32, #tpu.memory_space<vmem>>) attributes {dimension_semantics = [#tpu.dimension_semantics<parallel>], iteration_bounds = array<i64: 1>, scalar_prefetch = 0 : i64, scratch_operands = 0 : i64, tpu.core_type = #tpu.core_type<tc>, window_params = [{transform_indices = @transform_0, window_bounds = array<i64: 2, 8, 128>}, {transform_indices = @transform_1, window_bounds = array<i64: 2, 1, 1>}, {pipeline_mode = #tpu.pipeline_mode<synchronous>, transform_indices = @transform_2, window_bounds = array<i64: 1, 1, 128>}, {pipeline_mode = #tpu.pipeline_mode<synchronous>, transform_indices = @transform_3, window_bounds = array<i64: 1, 1, 128>}, {pipeline_mode = #tpu.pipeline_mode<synchronous>, transform_indices = @transform_4, window_bounds = array<i64: 1, 1, 128>}, {transform_indices = @transform_5, window_bounds = array<i64: 2, 1, 128>}, {transform_indices = @transform_6, window_bounds = array<i64: 2, 1, 128>}]} {
    %c0 = arith.constant 0 : index
    %c0_0 = arith.constant 0 : index
    %c0_1 = arith.constant 0 : index
    %0 = vector.load %arg1[%c0, %c0_0, %c0_1] : memref<2x8x128xf32, #tpu.memory_space<vmem>>, vector<2x8x128xf32>
    %c0_2 = arith.constant 0 : index
    %c0_3 = arith.constant 0 : index
    %c0_4 = arith.constant 0 : index
    %1 = vector.load %arg3[%c0_2, %c0_3, %c0_4] : memref<1x1x128xf32, #tpu.memory_space<vmem>>, vector<1x1x128xf32>
    %2 = vector.shape_cast %1 : vector<1x1x128xf32> to vector<1x1x128xf32>
    %3 = vector.broadcast %2 : vector<1x1x128xf32> to vector<2x1x128xf32>
    "tpu.trace_start"() <{level = 10 : i32, message = "bqd,btd->bqt"}> : () -> ()
    %cst = arith.constant dense<0.000000e+00> : vector<2x1x8xf32>
    %4 = tpu.matmul %3, %0, %cst {dimension_numbers = #tpu.dot_dimension_numbers<[2], [2], [1], [1], [0, 0, 0, 1, 1, 1], [0], [0]>} : vector<2x1x128xf32>, vector<2x8x128xf32>, vector<2x1x8xf32> -> vector<2x1x8xf32>
    "tpu.trace_stop"() : () -> ()
    %5 = tpu.iota {dimensions = array<i32: 2>} : vector<2x1x8xi32>
    %c0_5 = arith.constant 0 : index
    %c0_6 = arith.constant 0 : index
    %c0_7 = arith.constant 0 : index
    %6 = vector.load %arg2[%c0_5, %c0_6, %c0_7] : memref<2x1x1xi32, #tpu.memory_space<vmem>>, vector<2x1x1xi32>
    %7 = vector.broadcast %6 : vector<2x1x1xi32> to vector<2x1x8xi32>
    %8 = arith.cmpi slt, %5, %7 : vector<2x1x8xi32>
    %cst_8 = arith.constant -1.000000e+30 : f32
    %9 = vector.broadcast %cst_8 : f32 to vector<2x1x8xf32>
    %10 = arith.select %8, %4, %9 : vector<2x1x8xi1>, vector<2x1x8xf32>
    %cst_9 = arith.constant dense<0xFF800000> : vector<2x1xf32>
    %11 = vector.multi_reduction <maximumf>, %10, %cst_9 [2] : vector<2x1x8xf32> to vector<2x1xf32>
    %12 = vector.shape_cast %11 : vector<2x1xf32> to vector<2x1x1xf32>
    %cst_10 = arith.constant -1.000000e+30 : f32
    %cst_11 = arith.constant 5.000000e-01 : f32
    %13 = arith.mulf %cst_10, %cst_11 : f32
    %14 = vector.broadcast %13 : f32 to vector<2x1x1xf32>
    %15 = arith.cmpf ogt, %12, %14 : vector<2x1x1xf32>
    %cst_12 = arith.constant 0.000000e+00 : f32
    %16 = vector.broadcast %cst_12 : f32 to vector<2x1x1xf32>
    %17 = arith.select %15, %12, %16 : vector<2x1x1xi1>, vector<2x1x1xf32>
    %18 = vector.broadcast %17 : vector<2x1x1xf32> to vector<2x1x8xf32>
    %19 = arith.subf %10, %18 : vector<2x1x8xf32>
    %20 = math.exp %19 : vector<2x1x8xf32>
    %cst_13 = arith.constant dense<0.000000e+00> : vector<2x1xf32>
    %21 = vector.multi_reduction <add>, %20, %cst_13 [2] : vector<2x1x8xf32> to vector<2x1xf32>
    %22 = vector.shape_cast %21 : vector<2x1xf32> to vector<2x1x1xf32>
    %23 = tpu.reciprocal %22 {approx = true} : vector<2x1x1xf32> -> vector<2x1x1xf32>
    %24 = vector.broadcast %23 : vector<2x1x1xf32> to vector<2x1x8xf32>
    %25 = arith.mulf %20, %24 : vector<2x1x8xf32>
    "tpu.trace_start"() <{level = 10 : i32, message = "bqt,btd->bqd"}> : () -> ()
    %cst_14 = arith.constant dense<0.000000e+00> : vector<2x1x128xf32>
    %26 = tpu.matmul %25, %0, %cst_14 {dimension_numbers = #tpu.dot_dimension_numbers<[2], [1], [1], [2], [0, 0, 0, 1, 1, 2], [0], [0]>} : vector<2x1x8xf32>, vector<2x8x128xf32>, vector<2x1x128xf32> -> vector<2x1x128xf32>
    "tpu.trace_stop"() : () -> ()
    %c0_15 = arith.constant 0 : index
    %c0_16 = arith.constant 0 : index
    %c0_17 = arith.constant 0 : index
    %27 = vector.load %arg4[%c0_15, %c0_16, %c0_17] : memref<1x1x128xf32, #tpu.memory_space<vmem>>, vector<1x1x128xf32>
    %28 = vector.broadcast %27 : vector<1x1x128xf32> to vector<2x1x128xf32>
    %29 = arith.mulf %26, %28 : vector<2x1x128xf32>
    %cst_18 = arith.constant dense<0.000000e+00> : vector<2x1xf32>
    %30 = vector.multi_reduction <add>, %29, %cst_18 [2] : vector<2x1x128xf32> to vector<2x1xf32>
    %31 = vector.shape_cast %30 : vector<2x1xf32> to vector<2x1x1xf32>
    %c0_19 = arith.constant 0 : index
    %c0_20 = arith.constant 0 : index
    %c0_21 = arith.constant 0 : index
    %32 = vector.load %arg5[%c0_19, %c0_20, %c0_21] : memref<1x1x128xf32, #tpu.memory_space<vmem>>, vector<1x1x128xf32>
    %33 = vector.broadcast %31 : vector<2x1x1xf32> to vector<2x1x128xf32>
    %34 = vector.broadcast %32 : vector<1x1x128xf32> to vector<2x1x128xf32>
    %35 = arith.addf %33, %34 : vector<2x1x128xf32>
    %36 = arith.negf %35 : vector<2x1x128xf32>
    %37 = math.exp %36 : vector<2x1x128xf32>
    %cst_22 = arith.constant 1.000000e+00 : f32
    %38 = vector.broadcast %cst_22 : f32 to vector<2x1x128xf32>
    %39 = arith.addf %38, %37 : vector<2x1x128xf32>
    %40 = arith.divf %38, %39 : vector<2x1x128xf32>
    %c0_23 = arith.constant 0 : index
    %c0_24 = arith.constant 0 : index
    %c0_25 = arith.constant 0 : index
    %41 = vector.load %arg6[%c0_23, %c0_24, %c0_25] : memref<2x1x128xf32, #tpu.memory_space<vmem>>, vector<2x1x128xf32>
    tpu.vector_store %arg6[%c0_23, %c0_24, %c0_25], %40 {strides = array<i32>} : memref<2x1x128xf32, #tpu.memory_space<vmem>>, vector<2x1x128xf32>,
    %42 = vector.extract_strided_slice %40 {offsets = [0, 0, 0], sizes = [2, 1, 1], strides = [1, 1, 1]} : vector<2x1x128xf32> to vector<2x1x1xf32>
    %43 = vector.broadcast %42 : vector<2x1x1xf32> to vector<2x1x128xf32>
    %44 = arith.mulf %43, %26 : vector<2x1x128xf32>
    %c0_26 = arith.constant 0 : index
    %c0_27 = arith.constant 0 : index
    %c0_28 = arith.constant 0 : index
    %45 = vector.load %arg7[%c0_26, %c0_27, %c0_28] : memref<2x1x128xf32, #tpu.memory_space<vmem>>, vector<2x1x128xf32>
    tpu.vector_store %arg7[%c0_26, %c0_27, %c0_28], %44 {strides = array<i32>} : memref<2x1x128xf32, #tpu.memory_space<vmem>>, vector<2x1x128xf32>,
    return
  }
  func.func @transform_0(%arg0: i32) -> (i32, i32, i32) {
    %c0_i32 = arith.constant 0 : i32
    %c0_i32_0 = arith.constant 0 : i32
    %c0_i32_1 = arith.constant 0 : i32
    return %arg0, %c0_i32, %c0_i32_0 : i32, i32, i32
  }
  func.func @transform_1(%arg0: i32) -> (i32, i32, i32) {
    %c0_i32 = arith.constant 0 : i32
    %c0_i32_0 = arith.constant 0 : i32
    %c0_i32_1 = arith.constant 0 : i32
    return %arg0, %c0_i32, %c0_i32_0 : i32, i32, i32
  }
  func.func @transform_2(%arg0: i32) -> (i32, i32, i32) {
    %c0_i32 = arith.constant 0 : i32
    %c0_i32_0 = arith.constant 0 : i32
    %c0_i32_1 = arith.constant 0 : i32
    %c0_i32_2 = arith.constant 0 : i32
    return %c0_i32, %c0_i32_0, %c0_i32_1 : i32, i32, i32
  }
  func.func @transform_3(%arg0: i32) -> (i32, i32, i32) {
    %c0_i32 = arith.constant 0 : i32
    %c0_i32_0 = arith.constant 0 : i32
    %c0_i32_1 = arith.constant 0 : i32
    %c0_i32_2 = arith.constant 0 : i32
    return %c0_i32, %c0_i32_0, %c0_i32_1 : i32, i32, i32
  }
  func.func @transform_4(%arg0: i32) -> (i32, i32, i32) {
    %c0_i32 = arith.constant 0 : i32
    %c0_i32_0 = arith.constant 0 : i32
    %c0_i32_1 = arith.constant 0 : i32
    %c0_i32_2 = arith.constant 0 : i32
    return %c0_i32, %c0_i32_0, %c0_i32_1 : i32, i32, i32
  }
  func.func @transform_5(%arg0: i32) -> (i32, i32, i32) {
    %c0_i32 = arith.constant 0 : i32
    %c0_i32_0 = arith.constant 0 : i32
    %c0_i32_1 = arith.constant 0 : i32
    return %arg0, %c0_i32, %c0_i32_0 : i32, i32, i32
  }
  func.func @transform_6(%arg0: i32) -> (i32, i32, i32) {
    %c0_i32 = arith.constant 0 : i32
    %c0_i32_0 = arith.constant 0 : i32
    %c0_i32_1 = arith.constant 0 : i32
    return %arg0, %c0_i32, %c0_i32_0 : i32, i32, i32
  }
}

</mosaic_0001>

<bundles_post_ra>
// kernel: tpu_custom_call.1
= control target key start
LH: loop header
LB: loop body
LE: loop exit
PB: predicated region body
PF: predicated region fallthrough
CT: control target
= control target key end

     0   :  { %12 = vsyncpa [#allocation3], 0  ;;  %s687_s0 = inlined_call_operand.hbm [shape: f32[2,8,128], index: 0, kind: input, shape index: {}]   ;;  %s688_s1 = inlined_call_operand.vmem [shape: s32[2,1,1], index: 1, kind: input, shape index: {}]   ;;  %s689_s2 = inlined_call_operand.vmem [shape: f32[1,1,128], index: 2, kind: input, shape index: {}]   ;;  %s690_s3 = inlined_call_operand.vmem [shape: f32[1,1,128], index: 3, kind: input, shape index: {}]   ;;  %s691_s4 = inlined_call_operand.vmem [shape: f32[1,1,128], index: 4, kind: input, shape index: {}]   ;;  %s692_s5 = inlined_call_operand.hbm [shape: f32[2,1,128], index: 5, kind: output, shape index: {0}]   ;;  %s693_s6 = inlined_call_operand.hbm [shape: f32[2,1,128], index: 6, kind: output, shape index: {1}]  }
   0x1   :  { %13 = vsyncpa [#allocation4], 0 }
   0x2   :  { %14 = vsyncpa [#allocation7], 0  ;;  %s583_s21 = smov [#allocation2]   ;;  %s511_s25 = scalar_lea.hbm %s687_s0, 256 }
   0x3   :  { %s20_s22 = sshll.u32 %s583_s21, 4  ;;  %p512_p0 = scmp.ne.s32.totalorder %s687_s0, %s511_s25  ;;  %s21_s22 = int_to_ptr.vmem [resolvable:$true] %s20_s22 }
   0x4   :  { %p515_p1 = scmp.lt.u32.totalorder %s511_s25, %s687_s0 }
   0x6   :  { %p517_p2 = pnand %p515_p1, %p512_p0 }
   0x8   :  { %520 = shalt.err (!%p517_p2)
}
   0x9   :  { %s521_s30 = scalar_lea.vmem %s21_s22, 256  ;;  %p526_p4 = scmp.lt.s32.totalorder %s21_s22, %s21_s22 }
   0xa   :  { %p522_p3 = scmp.ne.s32.totalorder %s21_s22, %s521_s30  ;;  %p527_p5 = scmp.lt.s32.totalorder %s521_s30, %s521_s30 }
   0xc   :  { %p528_p6 = por %p527_p5, %p526_p4 }
   0xe   :  { %p529_p7 = pnand %p528_p6, %p522_p3 }
  0x10   :  { %532 = shalt.err (!%p529_p7)
}
  0x11   :  { %s584_s7 = smov 128   ;;  %s585_s8 = smov 8  }
  0x12   :  { %26 = dma.hbm_to_vmem [thread:$0]  %s687_s0, 256, %s21_s22, [#allocation3], %s584_s7, %s584_s7, %s585_s8  }
  0x13   :  { %577 = dma.done.wait [#allocation3], 256  }
  0x14   :  { %578 = vsyncadd [#allocation3], 4294967040  ;;  %v586_v0 = vmov 0.0   ;;  %vm587_vm0 = vmmov 0   ;;  %v588_v1 = vmov 0   ;;  %v38_v2 = vld [vmem:[#allocation2] sm:$0xff]  ;;  %v181_v7 = vlaneseq }
  0x15   :  { %463 = vmatprep.subr.mxu0 %v586_v0  ;;  %468 = vmatprep.subr.mxu1 %v586_v0  ;;  %v39_v3 = vld [vmem:[#allocation2 + $0x8] sm:$0xff]  ;;  %v40_v4 = vld [vmem:[%s689_s2] sm:$0x1]  ;;  %v184_v6 = vld [vmem:[%s688_s1 + $0x1] sm:$0x1]  ;;  %vm203_vm2 = vcmask 57344  }
  0x16   :  { %465 = vmatprep.mubr.msk.f32.mxu0 %vm587_vm0, %v586_v0  ;;  %470 = vmatprep.mubr.msk.f32.mxu1 %vm587_vm0, %v586_v0  ;;  %v183_v5 = vld [vmem:[%s688_s1] sm:$0x1]  ;;  %v189_v8 = vshrl.u32 %v181_v7, 7  ;;  %v182_v13 = vand.u32 127, %v181_v7  ;;  %vm230_vm6 = vcmask 64512   ;;  %vm380_vm7 = vcmask 1040384  }
  0x17   :  { %493 = vset.pattern.permute.xlu0 %v588_v1  ;;  %494 = vset.pattern.permute.xlu1 %v588_v1  ;;  %v377_v41 = vld [vmem:[%s690_s3] sm:$0x1]  ;;  %s589_s3 = smov [#allocation5]  }
  0x18   :  { %464 = vmatpush3.xpose.msra.mxu0 %v38_v2  ;;  %469 = vmatpush3.xpose.msra.mxu1 %v39_v3  ;;  %v190_v10 = vsub.s32 0, %v189_v8  ;;  %v387_v50 = vld [vmem:[%s691_s4] sm:$0x1]  ;;  %s423_s4 = sshll.u32 %s589_s3, 4  ;;  %s424_s4 = int_to_ptr.vmem [resolvable:$true] %s423_s4 }
  0x19   :  { %186 = vperm.xlu0 %493, %v183_v5   ;;  %473 = vmatprep.subr.mxu0 %v586_v0  ;;  %s533_s18 = scalar_lea.vmem %s424_s4, 32  ;;  %p538_p9 = scmp.lt.s32.totalorder %s424_s4, %s424_s4 }
  0x1a   :  { %478 = vmatprep.subr.mxu1 %v586_v0  ;;  %p534_p8 = scmp.ne.s32.totalorder %s424_s4, %s533_s18  ;;  %p539_p10 = scmp.lt.s32.totalorder %s533_s18, %s533_s18 }
  0x1b   :  { %466 = vmatmul.mubr.f32.vlgmr.msra.gmra.mrb[0].mxu0 %v40_v4  ;;  %471 = vmatmul.mubr.f32.vlgmr.msra.gmra.mrb[0].mxu1 %v40_v4 }
  0x1c   :  { %474 = vmatpush3.msra.mxu0 %v38_v2  ;;  %475 = vmatprep.mubr.msk.f32.mxu0 %vm587_vm0, %v586_v0  ;;  %p540_p11 = por %p539_p10, %p538_p9 }
  0x1d   :  { %193 = vperm.xlu0 %493, %v184_v6   ;;  %479 = vmatpush3.msra.mxu1 %v39_v3 }
  0x1e   :  { %480 = vmatprep.mubr.msk.f32.mxu1 %vm587_vm0, %v586_v0  ;;  %p541_p12 = pnand %p540_p11, %p534_p8 }
  0x98   :  { %v187_v9 = vpop.permute.xlu0 %186 }
  0x99   :  { %v191_v12 = vrot.slane %v187_v9, %v190_v10 }
  0x9b   :  { %vm199_vm1 = vcmp.lt.s32.totalorder %v182_v13, %v191_v12 }
  0x9c   :  { %v194_v11 = vpop.permute.xlu0 %193 }
  0x9d   :  { %v198_v14 = vrot.slane %v194_v11, %v190_v10 }
  0x9f   :  { %vm200_vm3 = vcmp.lt.s32.totalorder %v182_v13, %v198_v14 }
  0xee   :  { %v107_v15 = vpop.f32.mrb[0].mxu0  ;;  %v177_v16 = vpop.f32.mrb[0].mxu1 }
  0xef   :  { %v201_v17 = vsel %vm199_vm1, %v107_v15, -1e+30  ;;  %v467_v18 = vpop.f32.mrb[1].mxu0  ;;  %v472_v19 = vpop.f32.mrb[1].mxu1  ;;  %v202_v21 = vsel %vm200_vm3, %v177_v16, -1e+30 }
  0xf0   :  { %v204_v20 = vsel %vm203_vm2, %v201_v17, -inf  ;;  %v207_v22 = vsel %vm203_vm2, %v202_v21, -inf }
  0xf1   :  { %205 = vmax.xlane.f32.xlu1 %v204_v20 }
  0xf5   :  { %208 = vmax.xlane.f32.xlu1 %v207_v22 }
 0x17e   :  { %v206_v23 = vpop.xlane.xlu1 %205 }
 0x17f   :  { %vm210_vm4 = vcmp.gt.f32.partialorder %v206_v23, -5e+29 }
 0x180   :  { %v212_v24 = vsel %vm210_vm4, %v206_v23, 0.0 }
 0x181   :  { %v214_v25 = vsub.f32 %v201_v17, %v212_v24 }
 0x182   :  { %v209_v26 = vpop.xlane.xlu1 %208 }
 0x183   :  { %v216_v27 = vmul.f32 1.442695, %v214_v25  ;;  %vm211_vm5 = vcmp.gt.f32.partialorder %v209_v26, -5e+29 }
 0x184   :  { %v213_v28 = vsel %vm211_vm5, %v209_v26, 0.0 }
 0x185   :  { %495 = vpow2.f32 %v216_v27  ;;  %v215_v29 = vsub.f32 %v202_v21, %v213_v28 }
 0x187   :  { %v218_v30 = vmul.f32 1.442695, %v215_v29 }
 0x189   :  { %497 = vpow2.f32 %v218_v30 }
 0x18f   :  { %v496_v31 = vpop.eup %495 }
 0x190   :  { %v220_v32 = vsel %vm203_vm2, %v496_v31, 0.0 }
 0x191   :  { %221 = vadd.xlane.f32.xlu0 %v220_v32 }
 0x193   :  { %v498_v33 = vpop.eup %497 }
 0x194   :  { %v223_v34 = vsel %vm203_vm2, %v498_v33, 0.0 }
 0x195   :  { %224 = vadd.xlane.f32.xlu1 %v223_v34 }
 0x21e   :  { %v222_v35 = vpop.xlane.xlu0 %221 }
 0x21f   :  { %499 = vrcp.f32 %v222_v35 }
 0x222   :  { %v225_v36 = vpop.xlane.xlu1 %224 }
 0x223   :  { %501 = vrcp.f32 %v225_v36 }
 0x229   :  { %v500_v37 = vpop.eup %499 }
 0x22a   :  { %v228_v38 = vmul.f32 %v500_v37, %v496_v31 }
 0x22c   :  { %476 = vmatmul.mubr.msk.f32.vlgmr.msra.gmra.mrb[2].mxu0 %vm230_vm6, %v228_v38 }
 0x22d   :  { %v502_v39 = vpop.eup %501 }
 0x22e   :  { %v229_v40 = vmul.f32 %v502_v39, %v498_v33 }
 0x230   :  { %481 = vmatmul.mubr.msk.f32.vlgmr.msra.gmra.mrb[2].mxu1 %vm230_vm6, %v229_v40 }
 0x2ff   :  { %v300_v42 = vpop.f32.mrb[2].mxu0 }
 0x300   :  { %v378_v43 = vmul.f32 %v377_v41, %v300_v42  ;;  %v477_v44 = vpop.f32.mrb[3].mxu0 }
 0x302   :  { %v381_v45 = vsel %vm380_vm7, %v378_v43, 0.0 }
 0x303   :  { %v373_v46 = vpop.f32.mrb[2].mxu1  ;;  %382 = vadd.xlane.f32.xlu1 %v381_v45 }
 0x304   :  { %v379_v47 = vmul.f32 %v377_v41, %v373_v46  ;;  %v482_v48 = vpop.f32.mrb[3].mxu1 }
 0x306   :  { %v384_v49 = vsel %vm380_vm7, %v379_v47, 0.0 }
 0x307   :  { %385 = vadd.xlane.f32.xlu1 %v384_v49 }
 0x390   :  { %v383_v51 = vpop.xlane.xlu1 %382 }
 0x391   :  { %v388_v52 = vadd.f32 %v387_v50, %v383_v51 }
 0x393   :  { %v453_v53 = vmul.f32 -1.442695, %v388_v52 }
 0x394   :  { %v386_v54 = vpop.xlane.xlu1 %385 }
 0x395   :  { %503 = vpow2.f32 %v453_v53  ;;  %v389_v55 = vadd.f32 %v387_v50, %v386_v54 }
 0x397   :  { %v454_v56 = vmul.f32 -1.442695, %v389_v55 }
 0x399   :  { %505 = vpow2.f32 %v454_v56 }
 0x39f   :  { %v504_v57 = vpop.eup %503 }
 0x3a0   :  { %v396_v58 = vadd.f32 1.0, %v504_v57 }
 0x3a2   :  { %507 = vrcp.f32 %v396_v58 }
 0x3a3   :  { %v506_v59 = vpop.eup %505 }
 0x3a4   :  { %v397_v60 = vadd.f32 1.0, %v506_v59 }
 0x3a6   :  { %509 = vrcp.f32 %v397_v60 }
 0x3ac   :  { %v508_v61 = vpop.eup %507 }
 0x3ad   :  { %402 = vst [vmem:[#allocation5] sm:$0x1] %v508_v61  ;;  %406 = vperm.xlu1 %494, %v508_v61  }
 0x3b0   :  { %v510_v62 = vpop.eup %509 }
 0x3b1   :  { %403 = vst [vmem:[#allocation5 + $0x1] sm:$0x1] %v510_v62  ;;  %411 = vperm.xlu1 %494, %v510_v62  }
 0x3b2   :  { %544 = shalt.err (!%p541_p12)
}
 0x3b3   :  { %s545_s21 = scalar_lea.hbm %s692_s5, 32 }
 0x3b4   :  { %p546_p13 = scmp.ne.s32.totalorder %s692_s5, %s545_s21  ;;  %p549_p0 = scmp.lt.u32.totalorder %s545_s21, %s692_s5 }
 0x3b6   :  { %p551_p1 = pnand %p549_p0, %p546_p13 }
 0x3b8   :  { %554 = shalt.err (!%p551_p1)
}
 0x3b9   :  { %s590_s26 = smov 16   ;;  %s591_s27 = smov 1  }
 0x3ba   :  { %429 = dma.vmem_to_hbm [thread:$0]  %s424_s4, 32, %s692_s5, [#allocation4], %s590_s26, %s590_s26, %s591_s27  }
 0x3bb   :  { %s592_s30 = smov [#allocation6]  }
 0x3bc   :  { %s435_s7 = sshll.u32 %s592_s30, 4  ;;  %s436_s7 = int_to_ptr.vmem [resolvable:$true] %s435_s7 }
 0x3bd   :  { %s555_s8 = scalar_lea.vmem %s436_s7, 32  ;;  %p560_p3 = scmp.lt.s32.totalorder %s436_s7, %s436_s7 }
 0x3be   :  { %p556_p2 = scmp.ne.s32.totalorder %s436_s7, %s555_s8  ;;  %p561_p4 = scmp.lt.s32.totalorder %s555_s8, %s555_s8 }
 0x3c0   :  { %p562_p5 = por %p561_p4, %p560_p3 }
 0x3c2   :  { %p563_p6 = pnand %p562_p5, %p556_p2 }
 0x42c   :  { %v407_v63 = vpop.permute.xlu1 %406 }
 0x42d   :  { %v414_v0 = vmul.f32 %v407_v63, %v300_v42 }
 0x42f   :  { %416 = vst [vmem:[#allocation6] sm:$0x1] %v414_v0 }
 0x430   :  { %v412_v1 = vpop.permute.xlu1 %411 }
 0x431   :  { %v415_v2 = vmul.f32 %v412_v1, %v373_v46 }
 0x433   :  { %417 = vst [vmem:[#allocation6 + $0x1] sm:$0x1] %v415_v2 }
 0x434   :  { %566 = shalt.err (!%p563_p6)
}
 0x435   :  { %s567_s5 = scalar_lea.hbm %s693_s6, 32 }
 0x436   :  { %p568_p7 = scmp.ne.s32.totalorder %s693_s6, %s567_s5  ;;  %p571_p8 = scmp.lt.u32.totalorder %s567_s5, %s693_s6 }
 0x438   :  { %p573_p9 = pnand %p571_p8, %p568_p7 }
 0x43a   :  { %576 = shalt.err (!%p573_p9)
}
 0x43b   :  { %441 = dma.vmem_to_hbm [thread:$0]  %s436_s7, 32, %s693_s6, [#allocation7], %s590_s26, %s590_s26, %s591_s27  }
 0x43c   :  { %579 = dma.done.wait [#allocation4], 32  }
 0x43d   :  { %580 = vsyncadd [#allocation4], 4294967264 }
 0x43e   :  { %581 = dma.done.wait [#allocation7], 32  }
 0x43f   :  { %582 = vsyncadd [#allocation7], 4294967264 }
 0x440   :  { %448 = vsyncpa [#allocation3], 1 }
 0x441   :  { %449 = vsyncpa [#allocation4], 1 }
 0x442   :  { %450 = vsyncpa [#allocation7], 1 }

</bundles_post_ra>
